<compile_context>
chip_gen: v5e
topology: v5e:2x2
jax: 0.10.0
libtpu: 0.0.40
codegen_flags: <defaults>
</compile_context>

<pallas_src>
import jax
import jax.numpy as jnp
from jax import lax
from jax.experimental import pallas as pl
from jax.experimental.pallas import tpu as pltpu


# ---------------------------------------------------------------------------
# Kernels:  out = x @ W^T + b   (W already transposed to [C_in, C_out])
# ---------------------------------------------------------------------------
def _fcs_kernel_inplace(x_ref, w_ref, b_ref, o_ref):
    """f32 output: accumulate directly into the resident output block."""
    k = pl.program_id(2)

    @pl.when(k == 0)
    def _():
        o_ref[...] = jnp.broadcast_to(b_ref[...], o_ref.shape)

    o_ref[...] += jnp.dot(x_ref[...], w_ref[...],
                          preferred_element_type=jnp.float32)


def _fcs_kernel_acc(x_ref, w_ref, b_ref, o_ref, acc_ref):
    """Low-precision output: f32 VMEM accumulator, cast on the last K step."""
    k = pl.program_id(2)

    @pl.when(k == 0)
    def _():
        acc_ref[...] = jnp.zeros_like(acc_ref)

    acc_ref[...] += jnp.dot(x_ref[...], w_ref[...],
                            preferred_element_type=jnp.float32)

    @pl.when(k == pl.num_programs(2) - 1)
    def _():
        o_ref[...] = (acc_ref[...] + b_ref[...]).astype(o_ref.dtype)


# ---------------------------------------------------------------------------
# Wrapper
# ---------------------------------------------------------------------------
def _round_up(x, m):
    return ((x + m - 1) // m) * m


def _vmem_budget_bytes():
    """Generation-aware scoped-VMEM request (leave headroom; cap at 96 MiB)."""
    phys = 64 << 20  # conservative default = v7x per-TC VMEM
    try:
        info = pltpu.get_tpu_info()
        phys = int(getattr(info, "vmem_capacity_bytes", phys)) or phys
    except Exception:
        pass
    return min(int(0.70 * phys), 96 << 20)


def fcs_forward(x, weight, bias, norm=False, *,
                compute_dtype=None, tm=512, tn=512, tk=1024):
    """x: [N, C_in]; weight: [C_out, C_in]; bias: [C_out] -> out: [N, C_out]."""
    n, c_in = x.shape
    c_out, c_in_w = weight.shape
    assert c_in_w == c_in and bias.shape == (c_out,)

    out_dtype = x.dtype

    # ---- one-pass weight prep in the wrapper (XLA fuses scale + transpose) --
    w32 = weight.astype(jnp.float32)
    if norm:
        # torch F.normalize(w, dim=0): divide each C_in column by its L2 norm
        # over C_out; 1/max(sqrt(s), 1e-12) == rsqrt(max(s, 1e-24)).
        inv = lax.rsqrt(jnp.maximum(jnp.sum(w32 * w32, axis=0), 1e-24))
        w32 = w32 * inv[None, :]
    w_t = w32.astype(weight.dtype).T                      # [C_in, C_out]

    cdt = jnp.dtype(compute_dtype) if compute_dtype is not None else jnp.dtype(x.dtype)
    x = x.astype(cdt)
    w_t = w_t.astype(cdt)

    in_item = cdt.itemsize
    out_item = jnp.dtype(out_dtype).itemsize
    needs_scratch = jnp.dtype(out_dtype) != jnp.dtype(jnp.float32)

    # ---- dtype-aware tile selection + VMEM budget ---------------------------
    sub_align = {4: 8, 2: 16, 1: 32}.get(in_item, 8)
    tm = min(_round_up(tm, sub_align), _round_up(n, sub_align))
    tn = min(_round_up(tn, 128), _round_up(c_out, 128))
    tk = min(_round_up(tk, 128), _round_up(c_in, 128))

    budget = _vmem_budget_bytes()

    def footprint(tm_, tn_, tk_):
        fp = 2 * (tm_ * tk_ + tk_ * tn_) * in_item        # double-buffered inputs
        fp += 2 * tm_ * tn_ * out_item                     # output block
        fp += 2 * tn_ * 4                                  # bias block
        if needs_scratch:
            fp += tm_ * tn_ * 4                            # f32 accumulator
        return fp

    while footprint(tm, tn, tk) > budget:
        if tk > 256:
            tk = max(256, tk // 2)
        elif tn > 128:
            tn = max(128, tn // 2)
        elif tm > sub_align:
            tm = max(sub_align, _round_up(tm // 2, sub_align))
        else:
            break

    # Keep >= 2 parallel (M, N) tiles where possible so both v7x TCs get work.
    if (_round_up(n, tm) // tm) * (_round_up(c_out, tn) // tn) < 2:
        if tn >= 256:
            tn //= 2
        elif tm >= 2 * sub_align:
            tm = _round_up(tm // 2, sub_align)

    pm, pk, pn = _round_up(n, tm), _round_up(c_in, tk), _round_up(c_out, tn)

    # ---- zero-pad to tile multiples (zeros are exact for matmul + bias) -----
    x_p = x if (pm == n and pk == c_in) else jnp.pad(x, ((0, pm - n), (0, pk - c_in)))
    w_p = w_t if (pk == c_in and pn == c_out) else jnp.pad(
        w_t, ((0, pk - c_in), (0, pn - c_out)))
    b_p = bias.astype(jnp.float32).reshape(1, c_out)
    if pn != c_out:
        b_p = jnp.pad(b_p, ((0, 0), (0, pn - c_out)))

    grid = (pm // tm, pn // tn, pk // tk)

    in_specs = [
        pl.BlockSpec((tm, tk), lambda i, j, k: (i, k)),    # x
        pl.BlockSpec((tk, tn), lambda i, j, k: (k, j)),    # W^T (pre-transposed)
        pl.BlockSpec((1, tn), lambda i, j, k: (0, j)),     # bias
    ]

    kernel = _fcs_kernel_acc if needs_scratch else _fcs_kernel_inplace
    scratch = [pltpu.VMEM((tm, tn), jnp.float32)] if needs_scratch else []

    out_p = pl.pallas_call(
        kernel,
        out_shape=jax.ShapeDtypeStruct((pm, pn), out_dtype),
        grid_spec=pltpu.PrefetchScalarGridSpec(
            num_scalar_prefetch=0,
            grid=grid,
            in_specs=in_specs,
            out_specs=pl.BlockSpec((tm, tn), lambda i, j, k: (i, j)),
            scratch_shapes=scratch,
        ),
        compiler_params=pltpu.CompilerParams(
            dimension_semantics=("parallel", "parallel", "arbitrary"),
            vmem_limit_bytes=int(budget)),
    )(x_p, w_p, b_p)

    if pm != n or pn != c_out:
        out_p = out_p[:n, :c_out]
    return out_p


def init_fcs_params(key, in_channels, out_channels):
    """Deterministic xavier_uniform_ weight [C_out, C_in], zero bias [C_out]."""
    bound = (6.0 / (in_channels + out_channels)) ** 0.5
    weight = jax.random.uniform(
        key, (out_channels, in_channels), jnp.float32, minval=-bound, maxval=bound)
    bias = jnp.zeros((out_channels,), jnp.float32)
    return weight, bias


if __name__ == "__main__":
    key = jax.random.PRNGKey(0)
    k_w, k_x, k_w2, k_x2 = jax.random.split(key, 4)

    # ---- Small shape from the module docstring (single-block path) ----------
    N, C_IN, C_OUT = 8, 32, 16
    weight, bias = init_fcs_params(k_w, C_IN, C_OUT)
    x = jax.random.normal(k_x, (N, C_IN), jnp.float32)

    out = jax.block_until_ready(fcs_forward(x, weight, bias, norm=False))
    ref = x @ weight.T + bias
    assert out.shape == (N, C_OUT)
    assert jnp.allclose(out, ref, atol=1e-5, rtol=1e-5)

    out_n = jax.block_until_ready(fcs_forward(x, weight, bias, norm=True))
    w_nrm = weight / jnp.maximum(
        jnp.linalg.norm(weight, axis=0, keepdims=True), 1e-12)
    ref_n = x @ w_nrm.T + bias
    assert jnp.allclose(out_n, ref_n, atol=1e-5, rtol=1e-5)

    # bf16 output path exercises the scratch-accumulator kernel.
    out_bf = jax.block_until_ready(
        fcs_forward(x.astype(jnp.bfloat16), weight, bias, norm=False,
                    compute_dtype=jnp.bfloat16))
    assert out_bf.dtype == jnp.bfloat16
    assert jnp.allclose(out_bf.astype(jnp.float32), ref, atol=1e-1, rtol=1e-1)

    # ---- Larger shape: tiled (M, N, K) grid -------------------------------
    N2, C_IN2, C_OUT2 = 512, 1024, 512
    weight2, bias2 = init_fcs_params(k_w2, C_IN2, C_OUT2)
    x2 = jax.random.normal(k_x2, (N2, C_IN2), jnp.float32)

    w2n = weight2 / jnp.maximum(
        jnp.linalg.norm(weight2, axis=0, keepdims=True), 1e-12)
    ref2 = jnp.dot(x2, w2n.T, precision=lax.Precision.HIGHEST) + bias2
    ref2b = jnp.dot(x2, weight2.T, precision=lax.Precision.HIGHEST) + bias2

    # Default (large) tiles; megacore adjustment keeps >= 2 parallel tiles.
    out2 = jax.block_until_ready(fcs_forward(x2, weight2, bias2, norm=True))
    assert out2.shape == (N2, C_OUT2)
    assert jnp.allclose(out2, ref2, atol=2e-3, rtol=2e-3)

    # Explicit smaller tiles -> grid (2, 2, 2): exercises K accumulation.
    out2b = jax.block_until_ready(
        fcs_forward(x2, weight2, bias2, norm=False, tm=256, tn=256, tk=512))
    assert jnp.allclose(out2b, ref2b, atol=2e-3, rtol=2e-3)

    # bf16 compute path (f32 accumulation), loose tolerance.
    out2c = jax.block_until_ready(
        fcs_forward(x2, weight2, bias2, norm=True, compute_dtype=jnp.bfloat16))
    assert jnp.allclose(out2c, ref2, atol=1e-1, rtol=1e-1)

    print("KERNEL_OK")
</pallas_src>

<mosaic_0001>
module attributes {stable_mosaic.version = 11 : i64} {
  func.func @_fcs_kernel_inplace(%arg0: i32, %arg1: i32, %arg2: i32, %arg3: memref<8x128xf32, #tpu.memory_space<vmem>>, %arg4: memref<128x128xf32, #tpu.memory_space<vmem>>, %arg5: memref<1x128xf32, #tpu.memory_space<vmem>>, %arg6: memref<8x128xf32, #tpu.memory_space<vmem>>) attributes {dimension_semantics = [#tpu.dimension_semantics<parallel>, #tpu.dimension_semantics<parallel>, #tpu.dimension_semantics<arbitrary>], iteration_bounds = array<i64: 1, 1, 1>, scalar_prefetch = 0 : i64, scratch_operands = 0 : i64, tpu.core_type = #tpu.core_type<tc>, window_params = [{transform_indices = @transform_0, window_bounds = array<i64: 8, 128>}, {transform_indices = @transform_1, window_bounds = array<i64: 128, 128>}, {transform_indices = @transform_2, window_bounds = array<i64: 1, 128>}, {transform_indices = @transform_3, window_bounds = array<i64: 8, 128>}]} {
    %c0_i32 = arith.constant 0 : i32
    %0 = arith.cmpi eq, %arg2, %c0_i32 : i32
    %1 = arith.extui %0 : i1 to i32
    %c0_i32_0 = arith.constant 0 : i32
    %2 = arith.cmpi ne, %1, %c0_i32_0 : i32
    scf.if %2 {
      %c0_8 = arith.constant 0 : index
      %c0_9 = arith.constant 0 : index
      %9 = vector.load %arg5[%c0_8, %c0_9] : memref<1x128xf32, #tpu.memory_space<vmem>>, vector<1x128xf32>
      %10 = vector.shape_cast %9 : vector<1x128xf32> to vector<1x128xf32>
      %11 = vector.broadcast %10 : vector<1x128xf32> to vector<8x128xf32>
      %c0_10 = arith.constant 0 : index
      %c0_11 = arith.constant 0 : index
      %12 = vector.load %arg6[%c0_10, %c0_11] : memref<8x128xf32, #tpu.memory_space<vmem>>, vector<8x128xf32>
      tpu.vector_store %arg6[%c0_10, %c0_11], %11 {strides = array<i32>} : memref<8x128xf32, #tpu.memory_space<vmem>>, vector<8x128xf32>,
    } else {
    }
    %c0 = arith.constant 0 : index
    %c0_1 = arith.constant 0 : index
    %3 = vector.load %arg6[%c0, %c0_1] : memref<8x128xf32, #tpu.memory_space<vmem>>, vector<8x128xf32>
    %c0_2 = arith.constant 0 : index
    %c0_3 = arith.constant 0 : index
    %4 = vector.load %arg3[%c0_2, %c0_3] : memref<8x128xf32, #tpu.memory_space<vmem>>, vector<8x128xf32>
    %c0_4 = arith.constant 0 : index
    %c0_5 = arith.constant 0 : index
    %5 = vector.load %arg4[%c0_4, %c0_5] : memref<128x128xf32, #tpu.memory_space<vmem>>, vector<128x128xf32>
    %cst = arith.constant dense<0.000000e+00> : vector<8x128xf32>
    %6 = tpu.matmul %4, %5, %cst {dimension_numbers = #tpu.dot_dimension_numbers<[1], [0], [0], [1], [0, 0, 1, 1], [], []>} : vector<8x128xf32>, vector<128x128xf32>, vector<8x128xf32> -> vector<8x128xf32>
    %7 = arith.addf %3, %6 : vector<8x128xf32>
    %c0_6 = arith.constant 0 : index
    %c0_7 = arith.constant 0 : index
    %8 = vector.load %arg6[%c0_6, %c0_7] : memref<8x128xf32, #tpu.memory_space<vmem>>, vector<8x128xf32>
    tpu.vector_store %arg6[%c0_6, %c0_7], %7 {strides = array<i32>} : memref<8x128xf32, #tpu.memory_space<vmem>>, vector<8x128xf32>,
    return
  }
  func.func @transform_0(%arg0: i32, %arg1: i32, %arg2: i32) -> (i32, i32) {
    %c0_i32 = arith.constant 0 : i32
    return %arg0, %arg2 : i32, i32
  }
  func.func @transform_1(%arg0: i32, %arg1: i32, %arg2: i32) -> (i32, i32) {
    %c0_i32 = arith.constant 0 : i32
    return %arg2, %arg1 : i32, i32
  }
  func.func @transform_2(%arg0: i32, %arg1: i32, %arg2: i32) -> (i32, i32) {
    %c0_i32 = arith.constant 0 : i32
    %c0_i32_0 = arith.constant 0 : i32
    return %c0_i32, %arg1 : i32, i32
  }
  func.func @transform_3(%arg0: i32, %arg1: i32, %arg2: i32) -> (i32, i32) {
    %c0_i32 = arith.constant 0 : i32
    return %arg0, %arg1 : i32, i32
  }
}

</mosaic_0001>

<bundles_post_ra>
// kernel: tpu_custom_call.1
= control target key start
LH: loop header
LB: loop body
LE: loop exit
PB: predicated region body
PF: predicated region fallthrough
CT: control target
= control target key end

     0   :  { %8 = vsyncpa [#allocation3], 0  ;;  %s233_s0 = inlined_call_operand.hbm [shape: f32[8,128], index: 0, kind: input, shape index: {}]   ;;  %s234_s1 = inlined_call_operand.hbm [shape: f32[128,128], index: 1, kind: input, shape index: {}]   ;;  %s235_s2 = inlined_call_operand.vmem [shape: f32[1,128], index: 2, kind: input, shape index: {}]   ;;  %s236_s3 = inlined_call_operand.hbm [shape: f32[8,128], index: 3, kind: output, shape index: {}]  }
   0x1   :  { %9 = vsyncpa [#allocation6], 0 }
   0x2   :  { %10 = vsyncpa [#allocation4], 0  ;;  %s16_s14 = sshll.u32 %s233_s0, 4  ;;  %s196_s15 = smov [#allocation2]   ;;  %s17_s14 = int_to_ptr.hbm [resolvable:$true] %s16_s14 }
   0x3   :  { %s18_s16 = sshll.u32 %s196_s15, 4  ;;  %s26_s19 = sshll.u32 %s234_s1, 4  ;;  %s19_s16 = int_to_ptr.vmem [resolvable:$true] %s18_s16  ;;  %s27_s19 = int_to_ptr.hbm [resolvable:$true] %s26_s19 }
   0x4   :  { %21 = dma.hbm_to_vmem [thread:$0]  %s17_s14, 128, %s19_s16, [#allocation3]  }
   0x5   :  { %s197_s20 = smov [#allocation5]   ;;  %s198_s22 = smov 128  }
   0x6   :  { %s28_s21 = sshll.u32 %s197_s20, 4  ;;  %s199_s23 = smov 8   ;;  %s29_s21 = int_to_ptr.vmem [resolvable:$true] %s28_s21 }
   0x7   :  { %34 = dma.hbm_to_vmem [thread:$0]  %s27_s19, 2048, %s29_s21, [#allocation6], %s198_s22, %s198_s22, %s199_s23  }
   0x8   :  { %190 = dma.done.wait [#allocation3], 128  }
   0x9   :  { %191 = vsyncadd [#allocation3], 4294967168 }
   0xa   :  { %192 = dma.done.wait [#allocation6], 2048  }
   0xb   :  { %193 = vsyncadd [#allocation6], 4294965248  ;;  %v71_v0 = vld [vmem:[#allocation5 + $0x78] sm:$0xff]  ;;  %v70_v1 = vld [vmem:[#allocation5 + $0x70] sm:$0xff]  ;;  %s200_s24 = smov [#allocation7]   ;;  %s101_s28 = sshll.u32 %s236_s3, 4  ;;  %s102_s28 = int_to_ptr.hbm [resolvable:$true] %s101_s28 }
   0xc   :  { %72 = vmatpush.msra.mxu0 %v71_v0  ;;  %v69_v2 = vld [vmem:[#allocation5 + $0x68] sm:$0xff]  ;;  %v68_v3 = vld [vmem:[#allocation5 + $0x60] sm:$0xff]  ;;  %v67_v4 = vld [vmem:[#allocation5 + $0x58] sm:$0xff]  ;;  %s99_s25 = sshll.u32 %s200_s24, 4  ;;  %s100_s25 = int_to_ptr.vmem [resolvable:$true] %s99_s25 }
   0xd   :  { %v66_v5 = vld [vmem:[#allocation5 + $0x50] sm:$0xff]  ;;  %v65_v6 = vld [vmem:[#allocation5 + $0x48] sm:$0xff]  ;;  %v64_v7 = vld [vmem:[#allocation5 + $0x40] sm:$0xff] }
   0xe   :  { %73 = vmatpush.msra.mxu0 %v70_v1  ;;  %v63_v8 = vld [vmem:[#allocation5 + $0x38] sm:$0xff]  ;;  %v62_v9 = vld [vmem:[#allocation5 + $0x30] sm:$0xff]  ;;  %v61_v10 = vld [vmem:[#allocation5 + $0x28] sm:$0xff] }
   0xf   :  { %v60_v11 = vld [vmem:[#allocation5 + $0x20] sm:$0xff]  ;;  %v59_v12 = vld [vmem:[#allocation5 + $0x18] sm:$0xff]  ;;  %v58_v13 = vld [vmem:[#allocation5 + $0x10] sm:$0xff] }
  0x10   :  { %74 = vmatpush.msra.mxu0 %v69_v2  ;;  %v57_v14 = vld [vmem:[#allocation5 + $0x8] sm:$0xff]  ;;  %v56_v15 = vld [vmem:[#allocation5] sm:$0xff]  ;;  %v55_v16 = vld [vmem:[#allocation2] sm:$0xff] }
  0x11   :  { %v117_v17 = vld [vmem:[%s235_s2] ss:$0 sm:$0xff] }
  0x12   :  { %75 = vmatpush.msra.mxu0 %v68_v3 }
  0x14   :  { %76 = vmatpush.msra.mxu0 %v67_v4 }
  0x16   :  { %77 = vmatpush.msra.mxu0 %v66_v5 }
  0x18   :  { %78 = vmatpush.msra.mxu0 %v65_v6 }
  0x1a   :  { %79 = vmatpush.msra.mxu0 %v64_v7 }
  0x1c   :  { %80 = vmatpush.msra.mxu0 %v63_v8 }
  0x1e   :  { %81 = vmatpush.msra.mxu0 %v62_v9 }
  0x20   :  { %82 = vmatpush.msra.mxu0 %v61_v10 }
  0x22   :  { %83 = vmatpush.msra.mxu0 %v60_v11 }
  0x24   :  { %84 = vmatpush.msra.mxu0 %v59_v12 }
  0x26   :  { %85 = vmatpush.msra.mxu0 %v58_v13 }
  0x28   :  { %86 = vmatpush.msra.mxu0 %v57_v14 }
  0x2a   :  { %87 = vmatpush.msra.mxu0 %v56_v15 }
  0x2b   :  { %88 = vmatmul.f32.vlgmr.msra.gmra.mxu0 %v55_v16 }
  0xa8   :  { %v89_v18 = vpop.f32.mrf.mxu0 }
  0xa9   :  { %v92_v19 = vadd.f32 %v117_v17, %v89_v18 }
  0xab   :  { %93 = vst [vmem:[#allocation7] sm:$0xff] %v92_v19 }
  0xac   :  { %104 = dma.vmem_to_hbm [thread:$0]  %s100_s25, 128, %s102_s28, [#allocation4]  }
  0xad   :  { %194 = dma.done.wait [#allocation4], 128  }
  0xae   :  { %195 = vsyncadd [#allocation4], 4294967168 }
  0xaf   :  { %109 = vsyncpa [#allocation3], 1 }
  0xb0   :  { %110 = vsyncpa [#allocation6], 1 }
  0xb1   :  { %111 = vsyncpa [#allocation4], 1 }

</bundles_post_ra>
